<compile_context>
chip_gen: v7x
topology: tpu7x:2x2x1
jax: 0.10.0
libtpu: 0.0.40
codegen_flags: <defaults>
</compile_context>

<pallas_src>
import jax
import jax.numpy as jnp
from jax.experimental import pallas as pl
from jax.experimental.pallas import tpu as pltpu

BN_EPS = 1e-5
LANE = 128
TN_HARD_MAX = 4096


def _round_up(x, m):
    return ((x + m - 1) // m) * m


def _vmem_limit_bytes():
    """Scoped-VMEM limit derived from the chip's physical VMEM (v5e/v6e: 128 MiB,
    v7x: 64 MiB), with headroom for Mosaic's own scratch."""
    try:
        cap = int(getattr(pltpu.get_tpu_info(), "vmem_capacity_bytes", 64 << 20))
    except Exception:
        cap = 64 << 20
    return int(min(cap * 3 // 4, 100 << 20))


def _pick_lane_tile(n, ci2, co2, vmem_limit):
    """Pad only to the next multiple of 128 lanes; pick the largest 128-multiple
    tile that divides the padded extent and whose double-buffered pass-2
    footprint fits in ~half the VMEM budget."""
    n128 = _round_up(n, LANE)
    per_lane_bytes = 2 * (ci2 * 2 + co2 * 2)          # 2 buffers * (x bf16 + out bf16)
    tn_cap = (vmem_limit // 2) // max(per_lane_bytes, 1)
    tn_cap = max(LANE, min(TN_HARD_MAX, (tn_cap // LANE) * LANE))
    nb = n128 // LANE
    tn = LANE
    for t in range(1, nb + 1):
        if nb % t == 0 and t * LANE <= tn_cap:
            tn = t * LANE
    return tn, n128


# ----------------------------------------------------------------------------
# Pass 1: per-batch channel sums and Gram matrix of the merged rfft slab.
# ----------------------------------------------------------------------------
def _stats_kernel(x_ref, sum_ref, gram_ref):
    # x_ref: (2Ci, TN) bf16 tile of the merged [real; imag] slab for one batch.
    # sum_ref / gram_ref: per-batch resident accumulators (f32).
    @pl.when(pl.program_id(1) == 0)
    def _():
        sum_ref[...] = jnp.zeros_like(sum_ref)
        gram_ref[...] = jnp.zeros_like(gram_ref)

    x = x_ref[...]
    dn = (((1,), (1,)), ((), ()))  # X @ X^T on the MXU (contract lane axes)
    gram_ref[...] += jax.lax.dot_general(x, x, dn, preferred_element_type=jnp.float32)
    sum_ref[...] += jnp.sum(x.astype(jnp.float32), axis=1, keepdims=True)


def _stats_pallas(x, tn, vmem_limit):
    b, ci2, npad = x.shape
    grid = (b, npad // tn)

    x_spec = pl.BlockSpec((pl.Squeezed(), ci2, tn), lambda bb, i: (bb, 0, i))
    sum_spec = pl.BlockSpec((pl.Squeezed(), ci2, 1), lambda bb, i: (bb, 0, 0))
    gram_spec = pl.BlockSpec((pl.Squeezed(), ci2, ci2), lambda bb, i: (bb, 0, 0))

    return pl.pallas_call(
        _stats_kernel,
        out_shape=(
            jax.ShapeDtypeStruct((b, ci2, 1), jnp.float32),
            jax.ShapeDtypeStruct((b, ci2, ci2), jnp.float32),
        ),
        grid=grid,
        in_specs=[x_spec],
        out_specs=(sum_spec, gram_spec),
        compiler_params=pltpu.CompilerParams(
            # batch axis parallel (v7x megacore); lane axis carries accumulators
            dimension_semantics=("parallel", "arbitrary"),
            vmem_limit_bytes=vmem_limit,
        ),
    )(x)


# ----------------------------------------------------------------------------
# Pass 2: fused 1x1 conv (channel matmul, K=2Ci) + BN affine + ReLU, lane-tiled.
# ----------------------------------------------------------------------------
def _apply_kernel(x_ref, w_ref, a_ref, b_ref, o_ref):
    # o = relu( (W @ X) * a + b )   for one (batch, lane-tile) block
    y = jnp.dot(w_ref[...], x_ref[...], preferred_element_type=jnp.float32)
    o_ref[...] = jnp.maximum(y * a_ref[...] + b_ref[...], 0.0).astype(o_ref.dtype)


def _apply_pallas(x, w, a, bias, tn, vmem_limit):
    b, ci2, npad = x.shape
    co2 = w.shape[0]
    grid = (b, npad // tn)

    x_spec = pl.BlockSpec((pl.Squeezed(), ci2, tn), lambda bb, i: (bb, 0, i))
    w_spec = pl.BlockSpec((co2, ci2), lambda bb, i: (0, 0))
    v_spec = pl.BlockSpec((co2, 1), lambda bb, i: (0, 0))
    o_spec = pl.BlockSpec((pl.Squeezed(), co2, tn), lambda bb, i: (bb, 0, i))

    flops = 2 * co2 * ci2 * b * npad
    bytes_accessed = (b * ci2 * npad * 2        # merged input slab (bf16)
                      + b * co2 * npad * 2      # output (bf16)
                      + co2 * ci2 * 2           # weight (bf16)
                      + 2 * co2 * 4)            # BN scale/bias (f32)

    return pl.pallas_call(
        _apply_kernel,
        out_shape=jax.ShapeDtypeStruct((b, co2, npad), jnp.bfloat16),
        grid=grid,
        in_specs=[x_spec, w_spec, v_spec, v_spec],
        out_specs=o_spec,
        compiler_params=pltpu.CompilerParams(
            dimension_semantics=("parallel", "parallel"),  # megacore-friendly
            vmem_limit_bytes=vmem_limit,
        ),
        cost_estimate=pl.CostEstimate(
            flops=flops, transcendentals=0, bytes_accessed=bytes_accessed),
    )(x, w, a, bias)


# ----------------------------------------------------------------------------
# Full FourierUnit forward (n_dim=2, groups=1).
# ----------------------------------------------------------------------------
def fourier_unit_forward(x, conv_weight, bn_gamma, bn_beta):
    """x: (B, Cin, H, W) f32; conv_weight: (2*Cout, 2*Cin) f32 (1x1, squeezed);
    bn_gamma/bn_beta: (2*Cout,) f32.  Returns (B, Cout, H, W) f32."""
    b, cin, h, w = x.shape
    co2 = conv_weight.shape[0]
    cout = co2 // 2
    ci2 = 2 * cin

    ffted = jnp.fft.rfftn(x.astype(jnp.float32), s=(h, w), axes=(2, 3),
                          norm="ortho")                        # (B, Cin, H, Wf) c64
    wf = ffted.shape[-1]
    n = h * wf

    vmem_limit = _vmem_limit_bytes()
    tn, n_pad = _pick_lane_tile(n, ci2, co2, vmem_limit)
    pad = n_pad - n                                            # always < 128

    # Merged [real; imag] slab on the channel axis: (B, 2Ci, Npad) bf16.
    # The concat/reshape/cast/pad fuse into the rfft post-processing in XLA.
    xri = jnp.concatenate([jnp.real(ffted), jnp.imag(ffted)], axis=1)
    xri = xri.reshape(b, ci2, n).astype(jnp.bfloat16)
    if pad:
        xri = jnp.pad(xri, ((0, 0), (0, 0), (0, pad)))         # zeros: stats-exact

    w_bf = conv_weight.astype(jnp.bfloat16)                    # (2Co, 2Ci)

    # --- pass 1: per-batch input statistics, reduced over batch in JAX ---
    sums, grams = _stats_pallas(xri, tn, vmem_limit)
    sum_x = jnp.sum(sums, axis=0)                              # (2Ci, 1)
    gram = jnp.sum(grams, axis=0)                              # (2Ci, 2Ci)

    # Training-mode BatchNorm stats of y = W @ X derived from X stats:
    #   mean_y = W mean_x ,  E[y^2] = diag(W G W^T) / N ,  var = E[y^2]-mean^2
    n_true = jnp.float32(b * n)
    w_f = w_bf.astype(jnp.float32)                             # same values as pass 2
    mean_y = w_f @ (sum_x / n_true)                            # (2Co, 1)
    ey2 = jnp.sum((w_f @ gram) * w_f, axis=1, keepdims=True) / n_true
    var = jnp.maximum(ey2 - mean_y * mean_y, 0.0)              # clamp vs cancellation
    inv_std = jax.lax.rsqrt(var + BN_EPS)
    a = bn_gamma.reshape(co2, 1).astype(jnp.float32) * inv_std
    bias = bn_beta.reshape(co2, 1).astype(jnp.float32) - mean_y * a

    # --- pass 2: fused conv + BN affine + ReLU ---
    out = _apply_pallas(xri, w_bf, a, bias, tn, vmem_limit)    # (B, 2Co, Npad) bf16

    out = out[:, :, :n].reshape(b, co2, h, wf)
    cplx = jax.lax.complex(out[:, :cout].astype(jnp.float32),
                           out[:, cout:].astype(jnp.float32))
    output = jnp.fft.irfftn(cplx, s=(h, w), axes=(2, 3), norm="ortho")
    return output.astype(jnp.float32)


if __name__ == "__main__":
    # Small shapes consistent with the module: B=2, Cin=Cout=4, spatial 16x16.
    B, CIN, COUT, H, W = 2, 4, 4, 16, 16

    key = jax.random.PRNGKey(0)
    kx, kw = jax.random.split(key)

    x = jax.random.normal(kx, (B, CIN, H, W), dtype=jnp.float32)

    # Conv2d(2*Cin -> 2*Cout, k=1, groups=1, bias=False) weight, squeezed to 2D.
    fan_in = 2 * CIN
    bound = 1.0 / float(jnp.sqrt(jnp.float32(fan_in)))
    conv_weight = jax.random.uniform(
        kw, (2 * COUT, 2 * CIN), dtype=jnp.float32, minval=-bound, maxval=bound
    )

    # BatchNorm2d default affine init: weight=1, bias=0.
    bn_gamma = jnp.ones((2 * COUT,), dtype=jnp.float32)
    bn_beta = jnp.zeros((2 * COUT,), dtype=jnp.float32)

    fwd = jax.jit(fourier_unit_forward)
    y = fwd(x, conv_weight, bn_gamma, bn_beta)
    jax.block_until_ready(y)

    assert y.shape == (B, COUT, H, W), y.shape
    assert y.dtype == jnp.float32
    print("KERNEL_OK")
</pallas_src>

<mosaic_0001>
module attributes {stable_mosaic.version = 11 : i64} {
  func.func @_stats_kernel(%arg0: i32, %arg1: i32, %arg2: memref<1x8x256xbf16, #tpu.memory_space<vmem>>, %arg3: memref<1x8x1xf32, #tpu.memory_space<vmem>>, %arg4: memref<1x8x8xf32, #tpu.memory_space<vmem>>) attributes {dimension_semantics = [#tpu.dimension_semantics<parallel>, #tpu.dimension_semantics<arbitrary>], iteration_bounds = array<i64: 2, 1>, scalar_prefetch = 0 : i64, scratch_operands = 0 : i64, tpu.core_type = #tpu.core_type<tc>, window_params = [{transform_indices = @transform_0, window_bounds = array<i64: 1, 8, 256>}, {transform_indices = @transform_1, window_bounds = array<i64: 1, 8, 1>}, {transform_indices = @transform_2, window_bounds = array<i64: 1, 8, 8>}]} {
    %c0_i32 = arith.constant 0 : i32
    %0 = arith.cmpi eq, %arg1, %c0_i32 : i32
    %1 = arith.extui %0 : i1 to i32
    %c0_i32_0 = arith.constant 0 : i32
    %2 = arith.cmpi ne, %1, %c0_i32_0 : i32
    scf.if %2 {
      %cst_16 = arith.constant 0.000000e+00 : f32
      %21 = vector.broadcast %cst_16 : f32 to vector<8x1xf32>
      %c0_17 = arith.constant 0 : index
      %c0_18 = arith.constant 0 : index
      %c0_19 = arith.constant 0 : index
      %22 = vector.load %arg3[%c0_17, %c0_18, %c0_19] : memref<1x8x1xf32, #tpu.memory_space<vmem>>, vector<1x8x1xf32>
      %23 = vector.shape_cast %22 : vector<1x8x1xf32> to vector<8x1xf32>
      %24 = vector.shape_cast %21 : vector<8x1xf32> to vector<1x8x1xf32>
      tpu.vector_store %arg3[%c0_17, %c0_18, %c0_19], %24 {strides = array<i32>} : memref<1x8x1xf32, #tpu.memory_space<vmem>>, vector<1x8x1xf32>,
      %cst_20 = arith.constant 0.000000e+00 : f32
      %25 = vector.broadcast %cst_20 : f32 to vector<8x8xf32>
      %c0_21 = arith.constant 0 : index
      %c0_22 = arith.constant 0 : index
      %c0_23 = arith.constant 0 : index
      %26 = vector.load %arg4[%c0_21, %c0_22, %c0_23] : memref<1x8x8xf32, #tpu.memory_space<vmem>>, vector<1x8x8xf32>
      %27 = vector.shape_cast %26 : vector<1x8x8xf32> to vector<8x8xf32>
      %28 = vector.shape_cast %25 : vector<8x8xf32> to vector<1x8x8xf32>
      tpu.vector_store %arg4[%c0_21, %c0_22, %c0_23], %28 {strides = array<i32>} : memref<1x8x8xf32, #tpu.memory_space<vmem>>, vector<1x8x8xf32>,
    } else {
    }
    %c0 = arith.constant 0 : index
    %c0_1 = arith.constant 0 : index
    %c0_2 = arith.constant 0 : index
    %3 = vector.load %arg2[%c0, %c0_1, %c0_2] : memref<1x8x256xbf16, #tpu.memory_space<vmem>>, vector<1x8x256xbf16>
    %4 = vector.shape_cast %3 : vector<1x8x256xbf16> to vector<8x256xbf16>
    %c0_3 = arith.constant 0 : index
    %c0_4 = arith.constant 0 : index
    %c0_5 = arith.constant 0 : index
    %5 = vector.load %arg4[%c0_3, %c0_4, %c0_5] : memref<1x8x8xf32, #tpu.memory_space<vmem>>, vector<1x8x8xf32>
    %6 = vector.shape_cast %5 : vector<1x8x8xf32> to vector<8x8xf32>
    %cst = arith.constant dense<0.000000e+00> : vector<8x8xf32>
    %7 = tpu.matmul %4, %4, %cst {dimension_numbers = #tpu.dot_dimension_numbers<[1], [1], [0], [0], [0, 0, 1, 0], [], []>} : vector<8x256xbf16>, vector<8x256xbf16>, vector<8x8xf32> -> vector<8x8xf32>
    %8 = arith.addf %6, %7 : vector<8x8xf32>
    %c0_6 = arith.constant 0 : index
    %c0_7 = arith.constant 0 : index
    %c0_8 = arith.constant 0 : index
    %9 = vector.load %arg4[%c0_6, %c0_7, %c0_8] : memref<1x8x8xf32, #tpu.memory_space<vmem>>, vector<1x8x8xf32>
    %10 = vector.shape_cast %9 : vector<1x8x8xf32> to vector<8x8xf32>
    %11 = vector.shape_cast %8 : vector<8x8xf32> to vector<1x8x8xf32>
    tpu.vector_store %arg4[%c0_6, %c0_7, %c0_8], %11 {strides = array<i32>} : memref<1x8x8xf32, #tpu.memory_space<vmem>>, vector<1x8x8xf32>,
    %c0_9 = arith.constant 0 : index
    %c0_10 = arith.constant 0 : index
    %c0_11 = arith.constant 0 : index
    %12 = vector.load %arg3[%c0_9, %c0_10, %c0_11] : memref<1x8x1xf32, #tpu.memory_space<vmem>>, vector<1x8x1xf32>
    %13 = vector.shape_cast %12 : vector<1x8x1xf32> to vector<8x1xf32>
    %14 = arith.extf %4 : vector<8x256xbf16> to vector<8x256xf32>
    %cst_12 = arith.constant dense<0.000000e+00> : vector<8xf32>
    %15 = vector.multi_reduction <add>, %14, %cst_12 [1] : vector<8x256xf32> to vector<8xf32>
    %16 = vector.shape_cast %15 : vector<8xf32> to vector<8x1xf32>
    %17 = arith.addf %13, %16 : vector<8x1xf32>
    %c0_13 = arith.constant 0 : index
    %c0_14 = arith.constant 0 : index
    %c0_15 = arith.constant 0 : index
    %18 = vector.load %arg3[%c0_13, %c0_14, %c0_15] : memref<1x8x1xf32, #tpu.memory_space<vmem>>, vector<1x8x1xf32>
    %19 = vector.shape_cast %18 : vector<1x8x1xf32> to vector<8x1xf32>
    %20 = vector.shape_cast %17 : vector<8x1xf32> to vector<1x8x1xf32>
    tpu.vector_store %arg3[%c0_13, %c0_14, %c0_15], %20 {strides = array<i32>} : memref<1x8x1xf32, #tpu.memory_space<vmem>>, vector<1x8x1xf32>,
    return
  }
  func.func @transform_0(%arg0: i32, %arg1: i32) -> (i32, i32, i32) {
    %c0_i32 = arith.constant 0 : i32
    %c0_i32_0 = arith.constant 0 : i32
    return %arg0, %c0_i32, %arg1 : i32, i32, i32
  }
  func.func @transform_1(%arg0: i32, %arg1: i32) -> (i32, i32, i32) {
    %c0_i32 = arith.constant 0 : i32
    %c0_i32_0 = arith.constant 0 : i32
    %c0_i32_1 = arith.constant 0 : i32
    return %arg0, %c0_i32, %c0_i32_0 : i32, i32, i32
  }
  func.func @transform_2(%arg0: i32, %arg1: i32) -> (i32, i32, i32) {
    %c0_i32 = arith.constant 0 : i32
    %c0_i32_0 = arith.constant 0 : i32
    %c0_i32_1 = arith.constant 0 : i32
    return %arg0, %c0_i32, %c0_i32_0 : i32, i32, i32
  }
}

module attributes {stable_mosaic.version = 11 : i64} {
  func.func @_apply_kernel(%arg0: i32, %arg1: i32, %arg2: memref<1x8x256xbf16, #tpu.memory_space<vmem>>, %arg3: memref<8x8xbf16, #tpu.memory_space<vmem>>, %arg4: memref<8x1xf32, #tpu.memory_space<vmem>>, %arg5: memref<8x1xf32, #tpu.memory_space<vmem>>, %arg6: memref<1x8x256xbf16, #tpu.memory_space<vmem>>) attributes {dimension_semantics = [#tpu.dimension_semantics<parallel>, #tpu.dimension_semantics<parallel>], iteration_bounds = array<i64: 2, 1>, scalar_prefetch = 0 : i64, scratch_operands = 0 : i64, tpu.core_type = #tpu.core_type<tc>, window_params = [{transform_indices = @transform_0, window_bounds = array<i64: 1, 8, 256>}, {pipeline_mode = #tpu.pipeline_mode<synchronous>, transform_indices = @transform_1, window_bounds = array<i64: 8, 8>}, {pipeline_mode = #tpu.pipeline_mode<synchronous>, transform_indices = @transform_2, window_bounds = array<i64: 8, 1>}, {pipeline_mode = #tpu.pipeline_mode<synchronous>, transform_indices = @transform_3, window_bounds = array<i64: 8, 1>}, {transform_indices = @transform_4, window_bounds = array<i64: 1, 8, 256>}]} {
    %c0 = arith.constant 0 : index
    %c0_0 = arith.constant 0 : index
    %0 = vector.load %arg3[%c0, %c0_0] : memref<8x8xbf16, #tpu.memory_space<vmem>>, vector<8x8xbf16>
    %c0_1 = arith.constant 0 : index
    %c0_2 = arith.constant 0 : index
    %c0_3 = arith.constant 0 : index
    %1 = vector.load %arg2[%c0_1, %c0_2, %c0_3] : memref<1x8x256xbf16, #tpu.memory_space<vmem>>, vector<1x8x256xbf16>
    %2 = vector.shape_cast %1 : vector<1x8x256xbf16> to vector<8x256xbf16>
    %cst = arith.constant dense<0.000000e+00> : vector<8x256xf32>
    %3 = tpu.matmul %0, %2, %cst {dimension_numbers = #tpu.dot_dimension_numbers<[1], [0], [0], [1], [0, 0, 1, 1], [], []>} : vector<8x8xbf16>, vector<8x256xbf16>, vector<8x256xf32> -> vector<8x256xf32>
    %c0_4 = arith.constant 0 : index
    %c0_5 = arith.constant 0 : index
    %4 = vector.load %arg4[%c0_4, %c0_5] : memref<8x1xf32, #tpu.memory_space<vmem>>, vector<8x1xf32>
    %5 = vector.broadcast %4 : vector<8x1xf32> to vector<8x256xf32>
    %6 = arith.mulf %3, %5 : vector<8x256xf32>
    %c0_6 = arith.constant 0 : index
    %c0_7 = arith.constant 0 : index
    %7 = vector.load %arg5[%c0_6, %c0_7] : memref<8x1xf32, #tpu.memory_space<vmem>>, vector<8x1xf32>
    %8 = vector.broadcast %7 : vector<8x1xf32> to vector<8x256xf32>
    %9 = arith.addf %6, %8 : vector<8x256xf32>
    %cst_8 = arith.constant 0.000000e+00 : f32
    %10 = vector.broadcast %cst_8 : f32 to vector<8x256xf32>
    %11 = arith.maximumf %9, %10 : vector<8x256xf32>
    %12 = arith.truncf %11 : vector<8x256xf32> to vector<8x256xbf16>
    %c0_9 = arith.constant 0 : index
    %c0_10 = arith.constant 0 : index
    %c0_11 = arith.constant 0 : index
    %13 = vector.load %arg6[%c0_9, %c0_10, %c0_11] : memref<1x8x256xbf16, #tpu.memory_space<vmem>>, vector<1x8x256xbf16>
    %14 = vector.shape_cast %13 : vector<1x8x256xbf16> to vector<8x256xbf16>
    %15 = vector.shape_cast %12 : vector<8x256xbf16> to vector<1x8x256xbf16>
    tpu.vector_store %arg6[%c0_9, %c0_10, %c0_11], %15 {strides = array<i32>} : memref<1x8x256xbf16, #tpu.memory_space<vmem>>, vector<1x8x256xbf16>,
    return
  }
  func.func @transform_0(%arg0: i32, %arg1: i32) -> (i32, i32, i32) {
    %c0_i32 = arith.constant 0 : i32
    %c0_i32_0 = arith.constant 0 : i32
    return %arg0, %c0_i32, %arg1 : i32, i32, i32
  }
  func.func @transform_1(%arg0: i32, %arg1: i32) -> (i32, i32) {
    %c0_i32 = arith.constant 0 : i32
    %c0_i32_0 = arith.constant 0 : i32
    %c0_i32_1 = arith.constant 0 : i32
    return %c0_i32, %c0_i32_0 : i32, i32
  }
  func.func @transform_2(%arg0: i32, %arg1: i32) -> (i32, i32) {
    %c0_i32 = arith.constant 0 : i32
    %c0_i32_0 = arith.constant 0 : i32
    %c0_i32_1 = arith.constant 0 : i32
    return %c0_i32, %c0_i32_0 : i32, i32
  }
  func.func @transform_3(%arg0: i32, %arg1: i32) -> (i32, i32) {
    %c0_i32 = arith.constant 0 : i32
    %c0_i32_0 = arith.constant 0 : i32
    %c0_i32_1 = arith.constant 0 : i32
    return %c0_i32, %c0_i32_0 : i32, i32
  }
  func.func @transform_4(%arg0: i32, %arg1: i32) -> (i32, i32, i32) {
    %c0_i32 = arith.constant 0 : i32
    %c0_i32_0 = arith.constant 0 : i32
    return %arg0, %c0_i32, %arg1 : i32, i32, i32
  }
}

</mosaic_0001>

<bundles_post_ra>
// kernel: fourier_unit_forward.2
= control target key start
LH: loop header
LB: loop body
LE: loop exit
PB: predicated region body
PF: predicated region fallthrough
CT: control target
= control target key end

     0   :  { %s430_s9 = smov 0   ;;  %s432_s10 = smov 0   ;;  %s468_s0 = inlined_call_operand.vmem [shape: bf16[2,8,256], index: 0, kind: input, shape index: {}]   ;;  %s469_s1 = inlined_call_operand.vmem [shape: f32[2,8,1], index: 1, kind: output, shape index: {0}]   ;;  %s470_s2 = inlined_call_operand.vmem [shape: f32[2,8,8], index: 2, kind: output, shape index: {1}]  }
   0x1   :  { %s434_s11 = smov 0  }
   0x2 LB: > { %s25_s12 = sadd.s32 1, %s408_s10  ;;  %p353_p0 = scmp.ge.s32.totalorder %s412_s11, 1  ;;  %s412_s11 = sphi %s434_s11, %s13_s11   ;;  %s408_s10 = sphi %s432_s10, %s472_s10   ;;  %s404_s9 = sphi %s430_s9, %s471_s9  }
   0x3   : > { %p27_p1 = scmp.ge.s32.totalorder %s25_s12, 2  ;;  %p134_p2 = scmp.lt.s32.totalorder %s412_s11, 3 }
   0x5   : > { %s474_s12 = smov (%p27_p1, %s25_s12), 0  ;;  %p135_p3 = pnand %p353_p0, %p134_p2 }
   0x6   : > { %p164_p4 = scmp.lt.s32.totalorder (!%p135_p3), %s404_s9, 1  ;;  %vm188_vm0 = vcmask (!%p135_p3), 64512   ;;  %v414_v1 = vmov (!%p135_p3), 0.0   ;;  %vm186_vm1 = vcmask (!%p135_p3), 7168  }
   0x7   : > { %138 = sbr.rel (%p135_p3) target bundleno = 243 (0xf3), region = 24 }
   0xe   : > { %s476_s9 = smov (!%p164_p4, %s404_s9), 1 }
   0xf   : > { %s362_s13 = sshll.u32 %s476_s9, 3 }
  0x10   : > { %s171_s16 = scalar_lea.vmem %s468_s0, %s362_s13  ;;  %s180_s19 = scalar_lea.vmem %s470_s2, %s362_s13 }
  0x11   : > { %v190_v0 = vld [vmem:[%s171_s16] sm:$0xff]  ;;  %189 = vst.msk [vmem:[%s180_s19] sm:$0xff] %vm188_vm0, %v414_v1  ;;  %s176_s22 = scalar_lea.vmem %s469_s1, %s362_s13 }
  0x12   : > { %v359_v2 = vcombine.high %v190_v0, %v190_v0  ;;  %v358_v3 = vcombine.low %v190_v0, %v190_v0  ;;  %v243_v4 = vunpack.c.l.bf16 %v190_v0  ;;  %v244_v5 = vunpack.c.h.bf16 %v190_v0  ;;  %187 = vst.msk [vmem:[%s176_s22] sm:$0xff] %vm186_vm1, %v414_v1 }
  0x14   : > { %199 = vmatprep.subr.bf16.mxu0 %v359_v2  ;;  %231 = vmatprep.mubr.bf16.mxu0 %v359_v2  ;;  %v245_v6 = vadd.f32 %v244_v5, %v243_v4 }
  0x15   : > { %200 = vmatpush1.bf16.xpose.msra.mxu0 %v358_v3 }
  0x16   : > { %246 = vadd.xlane.f32.xlu0 %v245_v6 }
  0x18   : > { %v191_v10 = vld [vmem:[%s180_s19] sm:$0xff] }
  0x19   : > { %v242_v7 = vld [vmem:[%s176_s22] sm:$0xff] }
  0x1c   : > { %232 = vmatmul.mubr.bf16.vlgmr.msra.gmra.mrb[0].mxu0 %v358_v3 }
  0xa3   : > { %v247_v8 = vpop.xlane.xlu0 %246 }
  0xa4   : > { %v248_v9 = vadd.f32 %v247_v8, %v242_v7 }
  0xa6   : > { %250 = vst.msk [vmem:[%s176_s22] sm:$0xff] %vm186_vm1, %v248_v9 }
  0xef   : > { %v233_v11 = vpop.f32.mrb[0].mxu0 }
  0xf0   : > { %v239_v12 = vadd.f32 %v233_v11, %v191_v10  ;;  %v235_v13 = vpop.f32.mrb[1].mxu0 }
  0xf1   : > { %v236_v14 = vpop.f32.mrb[2].mxu0 }
  0xf2   : > { %241 = vst.msk [vmem:[%s180_s19] sm:$0xff] %vm188_vm0, %v239_v12  ;;  %v237_v15 = vpop.f32.mrb[3].mxu0 }
  0xf3 PF: > { %s13_s11 = sadd.s32 1, %s412_s11   ;;  %s471_s9 = smov %s408_s10 }
  0xf4   : > { %p10_p5 = scmp.ge.s32.totalorder %s13_s11, 4   ;;  %s472_s10 = smov %s474_s12 }
  0xf6   :  { %12 = sbr.rel (!%p10_p5) target bundleno = 2 (0x2), region = 70 }

// kernel: fourier_unit_forward.3
= control target key start
LH: loop header
LB: loop body
LE: loop exit
PB: predicated region body
PF: predicated region fallthrough
CT: control target
= control target key end

     0   :  { %s508_s15 = smov 0   ;;  %s510_s16 = smov 0   ;;  %s553_s0 = inlined_call_operand.vmem [shape: bf16[2,8,256], index: 0, kind: input, shape index: {}]   ;;  %s554_s1 = inlined_call_operand.vmem [shape: bf16[8,8], index: 1, kind: input, shape index: {}]   ;;  %s555_s2 = inlined_call_operand.vmem [shape: f32[8,1], index: 2, kind: input, shape index: {}]   ;;  %s556_s3 = inlined_call_operand.vmem [shape: f32[8,1], index: 3, kind: input, shape index: {}]   ;;  %s557_s4 = inlined_call_operand.vmem [shape: bf16[2,8,256], index: 4, kind: output, shape index: {}]  }
   0x1   :  { %s512_s17 = smov 0  }
   0x2 LB: > { %s26_s18 = sadd.s32 1, %s476_s16  ;;  %p415_p0 = scmp.ge.s32.totalorder %s480_s17, 1  ;;  %s480_s17 = sphi %s512_s17, %s14_s17   ;;  %s476_s16 = sphi %s510_s16, %s559_s16   ;;  %s472_s15 = sphi %s508_s15, %s558_s15  }
   0x3   : > { %p28_p1 = scmp.ge.s32.totalorder %s26_s18, 2  ;;  %p183_p2 = scmp.lt.s32.totalorder %s480_s17, 3 }
   0x5   : > { %s561_s18 = smov (%p28_p1, %s26_s18), 0  ;;  %p184_p3 = pnand %p415_p0, %p183_p2 }
   0x6   : > { %p218_p4 = scmp.lt.s32.totalorder (!%p184_p3), %s472_s15, 1  ;;  %v482_v0 = vmov (!%p184_p3), 0   ;;  %v297_v1 = vld [vmem:[%s555_s2] sm:$0xff] (!%p184_p3)  ;;  %vm249_vm0 = vcmask (!%p184_p3), 1043456   ;;  %vm245_vm1 = vcmask (!%p184_p3), 64512  }
   0x7   : > { %187 = sbr.rel (%p184_p3) target bundleno = 246 (0xf6), region = 36  ;;  %288 = vmatprep.mubr.bf16.mxu0 (!%p184_p3), %v482_v0  ;;  %455 = vset.pattern.permute.xlu0 (!%p184_p3), %v482_v0  ;;  %v305_v2 = vld [vmem:[%s556_s3] sm:$0xff] (!%p184_p3) }
   0x8   : > { %300 = vperm.xlu0 (!%p184_p3), %455, %v297_v1   ;;  %v238_v7 = vld [vmem:[%s554_s1] sm:$0xf] (!%p184_p3) }
   0xc   : > { %308 = vperm.xlu0 (!%p184_p3), %455, %v305_v2  }
   0xe   : > { %s563_s15 = smov (!%p218_p4, %s472_s15), 1 }
   0xf   : > { %s427_s23 = sshll.u32 %s563_s15, 3 }
  0x10   : > { %s225_s26 = scalar_lea.vmem %s553_s0, %s427_s23  ;;  %s235_s5 = scalar_lea.vmem %s557_s4, %s427_s23 }
  0x11   : > { %v239_v3 = vld [vmem:[%s225_s26] sm:$0xff] }
  0x12   : > { %v421_v4 = vcombine.high %v239_v3, %v239_v3  ;;  %v420_v5 = vcombine.low %v239_v3, %v239_v3 }
  0x14   : > { %422 = vmatprep.subr.msk.bf16.mxu0 %vm249_vm0, %v421_v4  ;;  %v251_v6 = vsel %vm249_vm0, %v420_v5, 0 }
  0x15   : > { %257 = vmatpush1.bf16.msra.mxu0 %v251_v6 }
  0x18   : > { %423 = vmatmul.mubr.msk.bf16.vlgmr.msra.gmra.mrb[0].mxu0 %vm245_vm1, %v238_v7 }
  0x87   : > { %v301_v8 = vpop.permute.xlu0 %300 }
  0x8b   : > { %v309_v12 = vpop.permute.xlu0 %308 }
  0xeb   : > { %v290_v9 = vpop.f32.mrb[0].mxu0 }
  0xec   : > { %v303_v10 = vmul.f32 %v301_v8, %v290_v9  ;;  %v292_v11 = vpop.f32.mrb[1].mxu0 }
  0xed   : > { %v304_v13 = vmul.f32 %v301_v8, %v292_v11  ;;  %v294_v14 = vpop.f32.mrb[2].mxu0 }
  0xee   : > { %v311_v15 = vadd.f32 %v309_v12, %v303_v10  ;;  %v295_v16 = vpop.f32.mrb[3].mxu0 }
  0xef   : > { %v312_v17 = vadd.f32 %v309_v12, %v304_v13 }
  0xf0   : > { %v313_v18 = vmax.f32 %v311_v15, 0.0 }
  0xf1   : > { %v314_v19 = vmax.f32 %v312_v17, 0.0 }
  0xf3   : > { %v429_v20 = vpack.c.bf16 %v314_v19, %v313_v18 }
  0xf5   : > { %323 = vst [vmem:[%s235_s5] sm:$0xff] %v429_v20 }
  0xf6 PF: > { %s14_s17 = sadd.s32 1, %s480_s17   ;;  %s558_s15 = smov %s476_s16 }
  0xf7   : > { %p11_p5 = scmp.ge.s32.totalorder %s14_s17, 4   ;;  %s559_s16 = smov %s561_s18 }
  0xf9   :  { %13 = sbr.rel (!%p11_p5) target bundleno = 2 (0x2), region = 66 }

// kernel: reverse.1
= control target key start
LH: loop header
LB: loop body
LE: loop exit
PB: predicated region body
PF: predicated region fallthrough
CT: control target
= control target key end

     0   :  { %v71_v3 = vlaneseq  ;;  %v64_v9 = vld [vmem:[#allocation0 + $0x7] ss:$-1 sm:$0xff]  ;;  %v78_v12 = vld [vmem:[#allocation0 + $0x17] ss:$-1 sm:$0xff]  ;;  %s329_s0 = inlined_call_operand.vmem [shape: f32[2,4,16,7], index: 0, kind: input, shape index: {}]   ;;  %s330_s1 = inlined_call_operand.vmem [shape: f32[2,4,16,7], index: 1, kind: output, shape index: {}]  }
   0x1   :  { %v44_v0 = vld [vmem:[%s329_s0] sm:$0xff]  ;;  %v46_v1 = vld [vmem:[%s329_s0 + $0x8] sm:$0xff]  ;;  %v48_v2 = vld [vmem:[%s329_s0 + $0x10] sm:$0xff]  ;;  %v65_v10 = vrot.slane %v64_v9, 1  ;;  %v79_v14 = vrot.slane %v78_v12, 1 }
   0x2   :  { %45 = vst [vmem:[#allocation0 + $0x8] sm:$0xff] %v44_v0  ;;  %47 = vst [vmem:[#allocation0 + $0x18] sm:$0xff] %v46_v1  ;;  %v50_v4 = vld [vmem:[%s329_s0 + $0x18] sm:$0xff]  ;;  %v52_v5 = vld [vmem:[%s329_s0 + $0x20] sm:$0xff]  ;;  %v72_v11 = vshrl.u32 %v71_v3, 7 }
   0x3   :  { %49 = vst [vmem:[#allocation0 + $0x28] sm:$0xff] %v48_v2  ;;  %v54_v6 = vld [vmem:[%s329_s0 + $0x28] sm:$0xff]  ;;  %51 = vst [vmem:[#allocation0 + $0x38] sm:$0xff] %v50_v4  ;;  %v56_v7 = vld [vmem:[%s329_s0 + $0x30] sm:$0xff] }
   0x4   :  { %53 = vst [vmem:[#allocation0 + $0x48] sm:$0xff] %v52_v5  ;;  %55 = vst [vmem:[#allocation0 + $0x58] sm:$0xff] %v54_v6  ;;  %v58_v8 = vld [vmem:[%s329_s0 + $0x38] sm:$0xff]  ;;  %v92_v13 = vld [vmem:[#allocation0 + $0x27] ss:$-1 sm:$0xff]  ;;  %vm73_vm0 = vcmp.lt.s32.totalorder %v72_v11, 7 }
   0x5   :  { %57 = vst [vmem:[#allocation0 + $0x68] sm:$0xff] %v56_v7  ;;  %59 = vst [vmem:[#allocation0 + $0x78] sm:$0xff] %v58_v8  ;;  %v93_v15 = vrot.slane %v92_v13, 1  ;;  %v106_v16 = vld [vmem:[#allocation0 + $0x37] ss:$-1 sm:$0xff] }
   0x6   :  { %66 = vst [vmem:[#allocation1] sm:$0xff] %v65_v10  ;;  %v107_v17 = vrot.slane %v106_v16, 1  ;;  %v120_v18 = vld [vmem:[#allocation0 + $0x47] ss:$-1 sm:$0xff]  ;;  %v134_v19 = vld [vmem:[#allocation0 + $0x57] ss:$-1 sm:$0xff] }
   0x7   :  { %80 = vst [vmem:[#allocation1 + $0x8] sm:$0xff] %v79_v14  ;;  %94 = vst [vmem:[#allocation1 + $0x10] sm:$0xff] %v93_v15  ;;  %v121_v20 = vrot.slane %v120_v18, 1  ;;  %v135_v21 = vrot.slane %v134_v19, 1  ;;  %v148_v22 = vld [vmem:[#allocation0 + $0x67] ss:$-1 sm:$0xff] }
   0x8   :  { %v162_v23 = vld [vmem:[#allocation0 + $0x77] ss:$-1 sm:$0xff]  ;;  %108 = vst [vmem:[#allocation1 + $0x18] sm:$0xff] %v107_v17  ;;  %v149_v24 = vrot.slane %v148_v22, 1 }
   0x9   :  { %v163_v25 = vrot.slane %v162_v23, 1  ;;  %v69_v26 = vld [vmem:[#allocation0 + $0xf] ss:$-1 sm:$0xff]  ;;  %v83_v27 = vld [vmem:[#allocation0 + $0x1f] ss:$-1 sm:$0xff]  ;;  %122 = vst [vmem:[#allocation1 + $0x20] sm:$0xff] %v121_v20 }
   0xa   :  { %v97_v28 = vld [vmem:[#allocation0 + $0x2f] ss:$-1 sm:$0xff]  ;;  %136 = vst [vmem:[#allocation1 + $0x28] sm:$0xff] %v135_v21  ;;  %v70_v29 = vrot.slane %v69_v26, 1  ;;  %v84_v30 = vrot.slane %v83_v27, 1  ;;  %150 = vst [vmem:[#allocation1 + $0x30] sm:$0xff] %v149_v24 }
   0xb   :  { %v98_v31 = vrot.slane %v97_v28, 1  ;;  %v111_v32 = vld [vmem:[#allocation0 + $0x3f] ss:$-1 sm:$0xff]  ;;  %164 = vst [vmem:[#allocation1 + $0x38] sm:$0xff] %v163_v25  ;;  %v125_v34 = vld [vmem:[#allocation0 + $0x4f] ss:$-1 sm:$0xff] }
   0xc   :  { %v112_v33 = vrot.slane %v111_v32, 1  ;;  %v139_v35 = vld [vmem:[#allocation0 + $0x5f] ss:$-1 sm:$0xff]  ;;  %74 = vst.msk [vmem:[#allocation1] sm:$0xff] %vm73_vm0, %v70_v29  ;;  %88 = vst.msk [vmem:[#allocation1 + $0x8] sm:$0xff] %vm73_vm0, %v84_v30  ;;  %v126_v36 = vrot.slane %v125_v34, 1 }
   0xd   :  { %102 = vst.msk [vmem:[#allocation1 + $0x10] sm:$0xff] %vm73_vm0, %v98_v31  ;;  %v140_v37 = vrot.slane %v139_v35, 1  ;;  %v153_v38 = vld [vmem:[#allocation0 + $0x6f] ss:$-1 sm:$0xff]  ;;  %v167_v39 = vld [vmem:[#allocation0 + $0x7f] ss:$-1 sm:$0xff] }
   0xe   :  { %116 = vst.msk [vmem:[#allocation1 + $0x18] sm:$0xff] %vm73_vm0, %v112_v33  ;;  %v154_v40 = vrot.slane %v153_v38, 1  ;;  %v168_v41 = vrot.slane %v167_v39, 1  ;;  %130 = vst.msk [vmem:[#allocation1 + $0x20] sm:$0xff] %vm73_vm0, %v126_v36 }
   0xf   :  { %144 = vst.msk [vmem:[#allocation1 + $0x28] sm:$0xff] %vm73_vm0, %v140_v37 }
  0x10   :  { %158 = vst.msk [vmem:[#allocation1 + $0x30] sm:$0xff] %vm73_vm0, %v154_v40  ;;  %172 = vst.msk [vmem:[#allocation1 + $0x38] sm:$0xff] %vm73_vm0, %v168_v41 }
  0x13   :  { %v214_v42 = vld [vmem:[#allocation1] sm:$0xff]  ;;  %v216_v43 = vld [vmem:[#allocation1 + $0x8] sm:$0xff] }
  0x14   :  { %v218_v44 = vld [vmem:[#allocation1 + $0x10] sm:$0xff]  ;;  %215 = vst [vmem:[%s330_s1] sm:$0xff] %v214_v42  ;;  %217 = vst [vmem:[%s330_s1 + $0x8] sm:$0xff] %v216_v43 }
  0x15   :  { %219 = vst [vmem:[%s330_s1 + $0x10] sm:$0xff] %v218_v44  ;;  %v220_v45 = vld [vmem:[#allocation1 + $0x18] sm:$0xff]  ;;  %v222_v46 = vld [vmem:[#allocation1 + $0x20] sm:$0xff] }
  0x16   :  { %221 = vst [vmem:[%s330_s1 + $0x18] sm:$0xff] %v220_v45  ;;  %v224_v47 = vld [vmem:[#allocation1 + $0x28] sm:$0xff]  ;;  %223 = vst [vmem:[%s330_s1 + $0x20] sm:$0xff] %v222_v46 }
  0x17   :  { %225 = vst [vmem:[%s330_s1 + $0x28] sm:$0xff] %v224_v47  ;;  %v226_v48 = vld [vmem:[#allocation1 + $0x30] sm:$0xff]  ;;  %v228_v49 = vld [vmem:[#allocation1 + $0x38] sm:$0xff] }
  0x18   :  { %227 = vst [vmem:[%s330_s1 + $0x30] sm:$0xff] %v226_v48  ;;  %229 = vst [vmem:[%s330_s1 + $0x38] sm:$0xff] %v228_v49 }

</bundles_post_ra>
